<compile_context>
chip_gen: v7x
topology: tpu7x:2x2x1
jax: 0.10.0
libtpu: 0.0.40
codegen_flags: <defaults>
</compile_context>

<pallas_src>
import numpy as np
import jax
import jax.numpy as jnp
from jax.experimental import pallas as pl
from jax.experimental.pallas import tpu as pltpu


def _round_up(x, m):
    return (x + m - 1) // m * m


def patch_embed_kernel(p_ref, w_ref, b_ref, o_ref):
    # p_ref: (TM, Kp) bf16 patch tile; w_ref: (Kp, Ep) bf16 (resident);
    # b_ref: (1, Ep) f32.  Accumulate in f32 on the MXU, add bias, cast out.
    acc = jnp.dot(p_ref[...], w_ref[...], preferred_element_type=jnp.float32)
    o_ref[...] = (acc + b_ref[...]).astype(o_ref.dtype)


def patch_embed(x, w_conv, bias, patch_size, out_dtype=None):
    """x: (B, C, H, W).  w_conv: (E, C, P, P) PyTorch conv weight.  bias: (E,).

    Returns (B, num_patches, E) in `out_dtype` (default: x.dtype), matching
    Conv2d(C, E, kernel_size=P, stride=P)(x).flatten(2).transpose(1, 2).

    Note: MXU operands are bf16 (f32 accumulation), so results match the f32
    PyTorch conv at roughly bf16 precision.  Pass out_dtype=jnp.bfloat16 to
    also halve HBM writeback on v6e/v7x.
    """
    B, C, H, W = x.shape
    E = w_conv.shape[0]
    P = patch_size
    assert H % P == 0 and W % P == 0, "image size must be divisible by patch size"
    nh, nw = H // P, W // P
    num_patches = nh * nw
    M = B * num_patches
    K = C * P * P
    out_dtype = x.dtype if out_dtype is None else out_dtype
    out_bytes = jnp.dtype(out_dtype).itemsize

    # --- im2col: cast to bf16 FIRST so the (M, K) staging array is half-width
    # and the convert fuses with the transpose (wrapper is HBM-bound). --------
    # TODO(synk): the zero-copy alternative (grid over patch rows, DMA the
    # contiguous (1, C, P, W) slab and rearrange in-kernel on the idle XLU)
    # would remove this staging pass entirely; not done here to keep the
    # layout handling inside the kernel simple and robust.
    patches = (
        x.astype(jnp.bfloat16)
         .reshape(B, C, nh, P, nw, P)
         .transpose(0, 2, 4, 1, 3, 5)            # (B, nh, nw, C, P, P)
         .reshape(M, K)
    )

    # --- conv weight (E, C, P, P) -> matmul operand (K, E), same (c,kh,kw) order
    w_mat = w_conv.reshape(E, K).T.astype(jnp.bfloat16)
    b2d = bias.astype(jnp.float32).reshape(1, E)

    # --- pad K and E to multiples of 128: lane-dense stores, full MXU fill ----
    K_pad = _round_up(K, 128)
    E_pad = _round_up(E, 128)
    if K_pad != K:
        w_mat = jnp.pad(w_mat, ((0, K_pad - K), (0, 0)))
    if E_pad != E:
        w_mat = jnp.pad(w_mat, ((0, 0), (0, E_pad - E)))
        b2d = jnp.pad(b2d, ((0, 0), (0, E_pad - E)))

    # --- tile over the patch axis; weights/bias stay resident ----------------
    budget = 40 << 20                             # buffer budget, safe on all gens
    fixed_bytes = K_pad * E_pad * 2 + 2 * E_pad * 4

    def bufs(tm_):                                # double-buffered in/out tiles
        return fixed_bytes + 2 * tm_ * K_pad * 2 + 2 * tm_ * E_pad * out_bytes

    if M >= 512:
        tm = 256
        for cand in (512, 1024, 2048):
            # keep >= 2 grid steps so v7x's two TensorCores both get work
            if bufs(cand) <= budget and pl.cdiv(M, cand) >= 2:
                tm = cand
    elif M >= 32:
        tm = _round_up(pl.cdiv(M, 2), 16)         # 2 steps for megacore even when small
    else:
        tm = _round_up(max(M, 1), 16)             # 16: bf16 sublane packing

    m_pad = _round_up(M, tm)
    if m_pad != M or K_pad != K:
        patches = jnp.pad(patches, ((0, m_pad - M), (0, K_pad - K)))
    grid_m = m_pad // tm

    vmem_bytes = bufs(tm)
    # <= 48 MiB keeps pipeline headroom on v7x's 64 MiB per-TC VMEM; v5e/v6e
    # (128 MiB) have ample room either way.
    vmem_limit = int(min(max(vmem_bytes + (8 << 20), 32 << 20), 48 << 20))

    cost = pl.CostEstimate(
        flops=2 * m_pad * K_pad * E_pad,
        transcendentals=0,
        bytes_accessed=(m_pad * K_pad * 2 + K_pad * E_pad * 2 + E_pad * 4
                        + m_pad * E_pad * out_bytes),
    )

    out = pl.pallas_call(
        patch_embed_kernel,
        out_shape=jax.ShapeDtypeStruct((m_pad, E_pad), out_dtype),
        grid=(grid_m,),
        in_specs=[
            pl.BlockSpec((tm, K_pad), lambda i: (i, 0)),
            pl.BlockSpec((K_pad, E_pad), lambda i: (0, 0)),  # constant -> resident
            pl.BlockSpec((1, E_pad), lambda i: (0, 0)),
        ],
        out_specs=pl.BlockSpec((tm, E_pad), lambda i: (i, 0)),
        compiler_params=pltpu.CompilerParams(
            dimension_semantics=("parallel",),               # shard patch axis
            vmem_limit_bytes=vmem_limit,
        ),
        cost_estimate=cost,
    )(patches, w_mat, b2d)

    return out[:M, :E].reshape(B, num_patches, E)

# TODO(synk): the multi_conv=True branch (stacked strided Conv2d + ReLU) is not
# implemented; only the default single-conv patch projection is translated.


def reference_forward(x, w_conv, bias, patch_size):
    """Pure-JAX f32 reference matching the PyTorch forward."""
    P = patch_size
    y = jax.lax.conv_general_dilated(
        x, w_conv, window_strides=(P, P), padding="VALID",
        dimension_numbers=("NCHW", "OIHW", "NCHW"))
    B, E, nh, nw = y.shape
    y = y + bias.reshape(1, E, 1, 1)
    return y.reshape(B, E, nh * nw).transpose(0, 2, 1)


if __name__ == "__main__":
    # Small shapes consistent with the module: 32x32 image, 16x16 patches -> 4
    # patches per image; E=96 (a CrossViT width) exercises the E->128 padding.
    B, C, IMG, P, E = 2, 3, 32, 16, 96

    key = jax.random.PRNGKey(0)
    kx, kw, kb = jax.random.split(key, 3)
    x = jax.random.normal(kx, (B, C, IMG, IMG), jnp.float32)
    fan_in = C * P * P
    w_conv = jax.random.normal(kw, (E, C, P, P), jnp.float32) / np.sqrt(fan_in)
    bias = jax.random.normal(kb, (E,), jnp.float32) * 0.01

    out = patch_embed(x, w_conv, bias, P)
    out = jax.block_until_ready(out)

    ref = reference_forward(x, w_conv, bias, P)
    np.testing.assert_allclose(np.asarray(out), np.asarray(ref), rtol=2e-2, atol=2e-2)
    assert out.shape == (B, (IMG // P) ** 2, E)
    assert out.dtype == x.dtype

    print("KERNEL_OK")
</pallas_src>

<mosaic_0001>
module attributes {stable_mosaic.version = 11 : i64} {
  func.func @patch_embed_kernel(%arg0: i32, %arg1: memref<16x768xbf16, #tpu.memory_space<vmem>>, %arg2: memref<768x128xbf16, #tpu.memory_space<vmem>>, %arg3: memref<1x128xf32, #tpu.memory_space<vmem>>, %arg4: memref<16x128xf32, #tpu.memory_space<vmem>>) attributes {dimension_semantics = [#tpu.dimension_semantics<parallel>], iteration_bounds = array<i64: 1>, scalar_prefetch = 0 : i64, scratch_operands = 0 : i64, tpu.core_type = #tpu.core_type<tc>, window_params = [{transform_indices = @transform_0, window_bounds = array<i64: 16, 768>}, {pipeline_mode = #tpu.pipeline_mode<synchronous>, transform_indices = @transform_1, window_bounds = array<i64: 768, 128>}, {pipeline_mode = #tpu.pipeline_mode<synchronous>, transform_indices = @transform_2, window_bounds = array<i64: 1, 128>}, {transform_indices = @transform_3, window_bounds = array<i64: 16, 128>}]} {
    %c0 = arith.constant 0 : index
    %c0_0 = arith.constant 0 : index
    %0 = vector.load %arg1[%c0, %c0_0] : memref<16x768xbf16, #tpu.memory_space<vmem>>, vector<16x768xbf16>
    %c0_1 = arith.constant 0 : index
    %c0_2 = arith.constant 0 : index
    %1 = vector.load %arg2[%c0_1, %c0_2] : memref<768x128xbf16, #tpu.memory_space<vmem>>, vector<768x128xbf16>
    %cst = arith.constant dense<0.000000e+00> : vector<16x128xf32>
    %2 = tpu.matmul %0, %1, %cst {dimension_numbers = #tpu.dot_dimension_numbers<[1], [0], [0], [1], [0, 0, 1, 1], [], []>} : vector<16x768xbf16>, vector<768x128xbf16>, vector<16x128xf32> -> vector<16x128xf32>
    %c0_3 = arith.constant 0 : index
    %c0_4 = arith.constant 0 : index
    %3 = vector.load %arg3[%c0_3, %c0_4] : memref<1x128xf32, #tpu.memory_space<vmem>>, vector<1x128xf32>
    %4 = vector.broadcast %3 : vector<1x128xf32> to vector<16x128xf32>
    %5 = arith.addf %2, %4 : vector<16x128xf32>
    %c0_5 = arith.constant 0 : index
    %c0_6 = arith.constant 0 : index
    %6 = vector.load %arg4[%c0_5, %c0_6] : memref<16x128xf32, #tpu.memory_space<vmem>>, vector<16x128xf32>
    tpu.vector_store %arg4[%c0_5, %c0_6], %5 {strides = array<i32>} : memref<16x128xf32, #tpu.memory_space<vmem>>, vector<16x128xf32>,
    return
  }
  func.func @transform_0(%arg0: i32) -> (i32, i32) {
    %c0_i32 = arith.constant 0 : i32
    %c0_i32_0 = arith.constant 0 : i32
    return %arg0, %c0_i32 : i32, i32
  }
  func.func @transform_1(%arg0: i32) -> (i32, i32) {
    %c0_i32 = arith.constant 0 : i32
    %c0_i32_0 = arith.constant 0 : i32
    %c0_i32_1 = arith.constant 0 : i32
    return %c0_i32, %c0_i32_0 : i32, i32
  }
  func.func @transform_2(%arg0: i32) -> (i32, i32) {
    %c0_i32 = arith.constant 0 : i32
    %c0_i32_0 = arith.constant 0 : i32
    %c0_i32_1 = arith.constant 0 : i32
    return %c0_i32, %c0_i32_0 : i32, i32
  }
  func.func @transform_3(%arg0: i32) -> (i32, i32) {
    %c0_i32 = arith.constant 0 : i32
    %c0_i32_0 = arith.constant 0 : i32
    return %arg0, %c0_i32 : i32, i32
  }
}

</mosaic_0001>

<bundles_post_ra>
// kernel: tpu_custom_call.1
= control target key start
LH: loop header
LB: loop body
LE: loop exit
PB: predicated region body
PF: predicated region fallthrough
CT: control target
= control target key end

     0   :  { %8 = vsyncpa [#allocation3], 0  ;;  %s941_s0 = inlined_call_operand.hbm [shape: bf16[16,768], index: 0, kind: input, shape index: {}]   ;;  %s942_s1 = inlined_call_operand.hbm [shape: bf16[768,128], index: 1, kind: input, shape index: {}]   ;;  %s943_s2 = inlined_call_operand.vmem [shape: f32[1,128], index: 2, kind: input, shape index: {}]   ;;  %s944_s3 = inlined_call_operand.hbm [shape: f32[16,128], index: 3, kind: output, shape index: {}]  }
   0x1   :  { %9 = vsyncpa [#allocation6], 0 }
   0x2   :  { %10 = vsyncpa [#allocation4], 0  ;;  %s873_s12 = smov [#allocation2]   ;;  %s801_s16 = scalar_lea.hbm %s941_s0, 768 }
   0x3   :  { %s16_s13 = sshll.u32 %s873_s12, 4  ;;  %p802_p0 = scmp.ne.s32.totalorder %s941_s0, %s801_s16  ;;  %s17_s13 = int_to_ptr.vmem [resolvable:$true] %s16_s13 }
   0x4   :  { %p805_p1 = scmp.lt.u32.totalorder %s801_s16, %s941_s0 }
   0x6   :  { %p807_p2 = pnand %p805_p1, %p802_p0 }
   0x8   :  { %810 = shalt.err (!%p807_p2)
}
   0x9   :  { %s811_s21 = scalar_lea.vmem %s17_s13, 768  ;;  %p816_p4 = scmp.lt.s32.totalorder %s17_s13, %s17_s13 }
   0xa   :  { %p812_p3 = scmp.ne.s32.totalorder %s17_s13, %s811_s21  ;;  %p817_p5 = scmp.lt.s32.totalorder %s811_s21, %s811_s21 }
   0xc   :  { %p818_p6 = por %p817_p5, %p816_p4 }
   0xe   :  { %p819_p7 = pnand %p818_p6, %p812_p3 }
  0x10   :  { %822 = shalt.err (!%p819_p7)
}
  0x11   :  { %s874_s22 = smov 384   ;;  %s875_s23 = smov 24  }
  0x12   :  { %22 = dma.hbm_to_vmem [thread:$0]  %s941_s0, 768, %s17_s13, [#allocation3], %s874_s22, %s874_s22, %s875_s23  }
  0x13   :  { %s876_s26 = smov [#allocation5]   ;;  %s823_s30 = scalar_lea.hbm %s942_s1, 6144 }
  0x14   :  { %s28_s27 = sshll.u32 %s876_s26, 4  ;;  %p824_p8 = scmp.ne.s32.totalorder %s942_s1, %s823_s30  ;;  %s29_s27 = int_to_ptr.vmem [resolvable:$true] %s28_s27 }
  0x15   :  { %p827_p9 = scmp.lt.u32.totalorder %s823_s30, %s942_s1 }
  0x17   :  { %p829_p10 = pnand %p827_p9, %p824_p8 }
  0x19   :  { %832 = shalt.err (!%p829_p10)
}
  0x1a   :  { %s833_s8 = scalar_lea.vmem %s29_s27, 6144  ;;  %p838_p12 = scmp.lt.s32.totalorder %s29_s27, %s29_s27 }
  0x1b   :  { %p834_p11 = scmp.ne.s32.totalorder %s29_s27, %s833_s8  ;;  %p839_p13 = scmp.lt.s32.totalorder %s833_s8, %s833_s8 }
  0x1d   :  { %p840_p0 = por %p839_p13, %p838_p12 }
  0x1f   :  { %p841_p1 = pnand %p840_p0, %p834_p11 }
  0x21   :  { %844 = shalt.err (!%p841_p1)
}
  0x22   :  { %s877_s0 = smov 64   ;;  %s878_s9 = smov 4  }
  0x23   :  { %34 = dma.hbm_to_vmem [thread:$0]  %s942_s1, 6144, %s29_s27, [#allocation6], %s877_s0, %s877_s0, %s878_s9  }
  0x24   :  { %867 = dma.done.wait [#allocation3], 768  }
  0x25   :  { %868 = vsyncadd [#allocation3], 4294966528 }
  0x26   :  { %869 = dma.done.wait [#allocation6], 6144  }
  0x27   :  { %870 = vsyncadd [#allocation6], 4294961152  ;;  %v744_v0 = vld [vmem:[#allocation5 + $0x40] sm:$0xff]   ;;  %v748_v4 = vld [vmem:[#allocation5 + $0x48] sm:$0xff]  }
  0x28   :  { %v745_v1 = vld [vmem:[#allocation5] sm:$0xff]   ;;  %669 = vmatprep.subr.bf16.mxu0 %v744_v0  ;;  %v749_v5 = vld [vmem:[#allocation5 + $0x8] sm:$0xff]   ;;  %v752_v8 = vld [vmem:[#allocation5 + $0x50] sm:$0xff]  }
  0x29   :  { %v746_v2 = vld [vmem:[#allocation5 + $0xc0] sm:$0xff]   ;;  %670 = vmatpush3.bf16.msra.mxu0 %v745_v1  ;;  %v750_v6 = vld [vmem:[#allocation5 + $0xc8] sm:$0xff]   ;;  %v753_v9 = vld [vmem:[#allocation5 + $0x10] sm:$0xff]  }
  0x2a   :  { %v747_v3 = vld [vmem:[#allocation5 + $0x80] sm:$0xff]   ;;  %691 = vmatprep.subr.bf16.mxu1 %v746_v2  ;;  %671 = vmatprep.subr.bf16.mxu0 %v748_v4  ;;  %v751_v7 = vld [vmem:[#allocation5 + $0x88] sm:$0xff]   ;;  %v754_v10 = vld [vmem:[#allocation5 + $0xd0] sm:$0xff]  }
  0x2b   :  { %692 = vmatpush3.bf16.msra.mxu1 %v747_v3  ;;  %v755_v11 = vld [vmem:[#allocation5 + $0x90] sm:$0xff]   ;;  %v756_v12 = vld [vmem:[#allocation5 + $0x58] sm:$0xff]   ;;  %v760_v16 = vld [vmem:[#allocation5 + $0x60] sm:$0xff]  }
  0x2c   :  { %693 = vmatprep.subr.bf16.mxu1 %v750_v6  ;;  %v757_v13 = vld [vmem:[#allocation5 + $0x18] sm:$0xff]   ;;  %v761_v17 = vld [vmem:[#allocation5 + $0x20] sm:$0xff]   ;;  %v764_v20 = vld [vmem:[#allocation5 + $0x68] sm:$0xff]  }
  0x2d   :  { %672 = vmatpush3.bf16.msra.mxu0 %v749_v5  ;;  %v758_v14 = vld [vmem:[#allocation5 + $0xd8] sm:$0xff]   ;;  %v762_v18 = vld [vmem:[#allocation5 + $0xe0] sm:$0xff]   ;;  %v765_v21 = vld [vmem:[#allocation5 + $0x28] sm:$0xff]  }
  0x2e   :  { %673 = vmatprep.subr.bf16.mxu0 %v752_v8  ;;  %v759_v15 = vld [vmem:[#allocation5 + $0x98] sm:$0xff]   ;;  %v763_v19 = vld [vmem:[#allocation5 + $0xa0] sm:$0xff]   ;;  %v766_v22 = vld [vmem:[#allocation5 + $0xe8] sm:$0xff]  }
  0x2f   :  { %694 = vmatpush3.bf16.msra.mxu1 %v751_v7  ;;  %v767_v23 = vld [vmem:[#allocation5 + $0xa8] sm:$0xff]   ;;  %v768_v24 = vld [vmem:[#allocation5 + $0x70] sm:$0xff]   ;;  %v772_v28 = vld [vmem:[#allocation5 + $0x78] sm:$0xff]  }
  0x30   :  { %695 = vmatprep.subr.bf16.mxu1 %v754_v10  ;;  %v769_v25 = vld [vmem:[#allocation5 + $0x30] sm:$0xff]   ;;  %v773_v29 = vld [vmem:[#allocation5 + $0x38] sm:$0xff]   ;;  %v779_v34 = vld [vmem:[#allocation5 + $0x140] sm:$0xff]  }
  0x31   :  { %674 = vmatpush3.bf16.msra.mxu0 %v753_v9  ;;  %v770_v26 = vld [vmem:[#allocation5 + $0xf0] sm:$0xff]   ;;  %v774_v30 = vld [vmem:[#allocation5 + $0xf8] sm:$0xff]   ;;  %v783_v37 = vld [vmem:[#allocation5 + $0x100] sm:$0xff]  }
  0x32   :  { %675 = vmatprep.subr.bf16.mxu0 %v756_v12  ;;  %v771_v27 = vld [vmem:[#allocation5 + $0xb0] sm:$0xff]   ;;  %v778_v33 = vld [vmem:[#allocation5 + $0xb8] sm:$0xff]   ;;  %v784_v38 = vld [vmem:[#allocation5 + $0x148] sm:$0xff]  }
  0x33   :  { %696 = vmatpush3.bf16.msra.mxu1 %v755_v11  ;;  %v775_v31 = vld [vmem:[#allocation2] ss:$24 sps:$4 sm:$0xff]   ;;  %v777_v32 = vld [vmem:[#allocation2 + $0x4] ss:$24 sps:$4 sm:$0xff]   ;;  %v788_v42 = vld [vmem:[#allocation5 + $0x158] sm:$0xff]  }
  0x34   :  { %697 = vmatprep.subr.bf16.mxu1 %v758_v14  ;;  %503 = vmatprep.mubr.bf16.mxu0 %v777_v32  ;;  %v780_v35 = vld [vmem:[#allocation2 + $0x8] ss:$24 sps:$4 sm:$0xff]   ;;  %v782_v36 = vld [vmem:[#allocation2 + $0xc] ss:$24 sps:$4 sm:$0xff]   ;;  %v785_v39 = vld [vmem:[#allocation5 + $0x108] sm:$0xff]  }
  0x35   :  { %676 = vmatpush3.bf16.msra.mxu0 %v757_v13  ;;  %544 = vmatprep.mubr.bf16.mxu1 %v782_v36  ;;  %v786_v40 = vld [vmem:[#allocation5 + $0x150] sm:$0xff]   ;;  %v789_v43 = vld [vmem:[#allocation5 + $0x118] sm:$0xff]   ;;  %v790_v44 = vld [vmem:[#allocation5 + $0x160] sm:$0xff]  }
  0x36   :  { %677 = vmatprep.subr.bf16.mxu0 %v760_v16  ;;  %v787_v41 = vld [vmem:[#allocation5 + $0x110] sm:$0xff]   ;;  %v791_v45 = vld [vmem:[#allocation5 + $0x120] sm:$0xff]   ;;  %v792_v46 = vld [vmem:[#allocation5 + $0x168] sm:$0xff]  }
  0x37   :  { %698 = vmatpush3.bf16.msra.mxu1 %v759_v15  ;;  %v800_v47 = vld [vmem:[#allocation2 + $0x14] ss:$24 sps:$4 sm:$0xff]   ;;  %v793_v48 = vld [vmem:[#allocation5 + $0x128] sm:$0xff]   ;;  %v794_v49 = vld [vmem:[#allocation5 + $0x170] sm:$0xff]  }
  0x38   :  { %699 = vmatprep.subr.bf16.mxu1 %v762_v18  ;;  %v795_v50 = vld [vmem:[#allocation5 + $0x130] sm:$0xff]   ;;  %v796_v51 = vld [vmem:[#allocation5 + $0x178] sm:$0xff]  }
  0x39   :  { %678 = vmatpush3.bf16.msra.mxu0 %v761_v17  ;;  %v797_v52 = vld [vmem:[#allocation5 + $0x138] sm:$0xff]   ;;  %v614_v55 = vld [vmem:[%s943_s2] ss:$0 sm:$0xff]  ;;  %s879_s2 = smov [#allocation7]  }
  0x3a   :  { %679 = vmatprep.subr.bf16.mxu0 %v764_v20  ;;  %v798_v53 = vld [vmem:[#allocation2 + $0x10] ss:$24 sps:$4 sm:$0xff]   ;;  %s601_s13 = sshll.u32 %s879_s2, 4  ;;  %s602_s13 = int_to_ptr.vmem [resolvable:$true] %s601_s13 }
  0x3b   :  { %700 = vmatpush3.bf16.msra.mxu1 %v763_v19  ;;  %s845_s14 = scalar_lea.vmem %s602_s13, 256  ;;  %p850_p3 = scmp.lt.s32.totalorder %s602_s13, %s602_s13 }
  0x3c   :  { %701 = vmatprep.subr.bf16.mxu1 %v766_v22  ;;  %p846_p2 = scmp.ne.s32.totalorder %s602_s13, %s845_s14  ;;  %p851_p4 = scmp.lt.s32.totalorder %s845_s14, %s845_s14 }
  0x3d   :  { %680 = vmatpush3.bf16.msra.mxu0 %v765_v21 }
  0x3e   :  { %681 = vmatprep.subr.bf16.mxu0 %v768_v24  ;;  %p852_p5 = por %p851_p4, %p850_p3 }
  0x3f   :  { %702 = vmatpush3.bf16.msra.mxu1 %v767_v23 }
  0x40   :  { %703 = vmatprep.subr.bf16.mxu1 %v770_v26  ;;  %p853_p6 = pnand %p852_p5, %p846_p2 }
  0x41   :  { %682 = vmatpush3.bf16.msra.mxu0 %v769_v25 }
  0x42   :  { %683 = vmatprep.subr.bf16.mxu0 %v772_v28 }
  0x43   :  { %704 = vmatpush3.bf16.msra.mxu1 %v771_v27 }
  0x44   :  { %705 = vmatprep.subr.bf16.mxu1 %v774_v30 }
  0x45   :  { %684 = vmatpush3.bf16.msra.mxu0 %v773_v29 }
  0x46   :  { %713 = vmatprep.subr.bf16.mxu0 %v779_v34 }
  0x47   :  { %706 = vmatpush3.bf16.msra.mxu1 %v778_v33 }
  0x48   :  { %504 = vmatmul.mubr.bf16.vlgmr.msra.gmra.mrb[0].mxu0 %v775_v31 }
  0x49   :  { %714 = vmatpush3.bf16.msra.mxu0 %v783_v37  ;;  %585 = vmatprep.mubr.bf16.mxu0 %v800_v47 }
  0x4a   :  { %545 = vmatmul.mubr.bf16.vlgmr.msra.gmra.mrb[0].mxu1 %v780_v35  ;;  %715 = vmatprep.subr.bf16.mxu0 %v784_v38 }
  0x4d   :  { %716 = vmatpush3.bf16.msra.mxu0 %v785_v39 }
  0x4e   :  { %717 = vmatprep.subr.bf16.mxu0 %v786_v40 }
  0x51   :  { %718 = vmatpush3.bf16.msra.mxu0 %v787_v41 }
  0x52   :  { %719 = vmatprep.subr.bf16.mxu0 %v788_v42 }
  0x55   :  { %720 = vmatpush3.bf16.msra.mxu0 %v789_v43 }
  0x56   :  { %721 = vmatprep.subr.bf16.mxu0 %v790_v44 }
  0x59   :  { %722 = vmatpush3.bf16.msra.mxu0 %v791_v45 }
  0x5a   :  { %723 = vmatprep.subr.bf16.mxu0 %v792_v46 }
  0x5d   :  { %724 = vmatpush3.bf16.msra.mxu0 %v793_v48 }
  0x5e   :  { %725 = vmatprep.subr.bf16.mxu0 %v794_v49 }
  0x61   :  { %726 = vmatpush3.bf16.msra.mxu0 %v795_v50 }
  0x62   :  { %727 = vmatprep.subr.bf16.mxu0 %v796_v51 }
  0x65   :  { %728 = vmatpush3.bf16.msra.mxu0 %v797_v52 }
  0x68   :  { %586 = vmatmul.mubr.bf16.vlgmr.msra.gmra.mrb[4].mxu0 %v798_v53 }
 0x11b   :  { %v685_v54 = vpop.f32.mrb[0].mxu0 }
 0x11c   :  { %v686_v56 = vpop.f32.mrb[1].mxu0 }
 0x11d   :  { %v687_v57 = vadd.f32 %v686_v56, %v685_v54  ;;  %v688_v58 = vpop.f32.mrb[2].mxu0  ;;  %v707_v59 = vpop.f32.mrb[0].mxu1 }
 0x11e   :  { %v689_v60 = vpop.f32.mrb[3].mxu0  ;;  %v708_v63 = vpop.f32.mrb[1].mxu1 }
 0x11f   :  { %v506_v61 = vadd.f32 %v687_v57, %v614_v55  ;;  %v690_v62 = vadd.f32 %v689_v60, %v688_v58  ;;  %v709_v0 = vadd.f32 %v708_v63, %v707_v59  ;;  %v710_v1 = vpop.f32.mrb[2].mxu1 }
 0x120   :  { %v711_v3 = vpop.f32.mrb[3].mxu1 }
 0x121   :  { %v509_v2 = vadd.f32 %v690_v62, %v614_v55  ;;  %v547_v4 = vadd.f32 %v709_v0, %v506_v61  ;;  %v712_v5 = vadd.f32 %v711_v3, %v710_v1 }
 0x123   :  { %v550_v6 = vadd.f32 %v712_v5, %v509_v2 }
 0x13b   :  { %v729_v7 = vpop.f32.mrb[4].mxu0 }
 0x13c   :  { %v730_v8 = vpop.f32.mrb[5].mxu0 }
 0x13d   :  { %v731_v9 = vadd.f32 %v730_v8, %v729_v7  ;;  %v732_v10 = vpop.f32.mrb[6].mxu0 }
 0x13e   :  { %v733_v11 = vpop.f32.mrb[7].mxu0 }
 0x13f   :  { %v588_v12 = vadd.f32 %v731_v9, %v547_v4  ;;  %v734_v13 = vadd.f32 %v733_v11, %v732_v10 }
 0x141   :  { %594 = vst [vmem:[#allocation7] sm:$0xff] %v588_v12  ;;  %v591_v14 = vadd.f32 %v734_v13, %v550_v6 }
 0x143   :  { %595 = vst [vmem:[#allocation7 + $0x8] sm:$0xff] %v591_v14 }
 0x144   :  { %856 = shalt.err (!%p853_p6)
}
 0x145   :  { %s857_s17 = scalar_lea.hbm %s944_s3, 256 }
 0x146   :  { %p858_p7 = scmp.ne.s32.totalorder %s944_s3, %s857_s17  ;;  %p861_p8 = scmp.lt.u32.totalorder %s857_s17, %s944_s3 }
 0x148   :  { %p863_p9 = pnand %p861_p8, %p858_p7 }
 0x14a   :  { %866 = shalt.err (!%p863_p9)
}
 0x14b   :  { %s880_s22 = smov 128   ;;  %s881_s23 = smov 8  }
 0x14c   :  { %607 = dma.vmem_to_hbm [thread:$0]  %s602_s13, 256, %s944_s3, [#allocation4], %s880_s22, %s880_s22, %s881_s23  }
 0x14d   :  { %871 = dma.done.wait [#allocation4], 256  }
 0x14e   :  { %872 = vsyncadd [#allocation4], 4294967040 }
 0x14f   :  { %611 = vsyncpa [#allocation3], 1 }
 0x150   :  { %612 = vsyncpa [#allocation6], 1 }
 0x151   :  { %613 = vsyncpa [#allocation4], 1 }

</bundles_post_ra>
